<compile_context>
chip_gen: v7x
topology: tpu7x:2x2x1
jax: 0.10.0
libtpu: 0.0.40
codegen_flags: <defaults>
</compile_context>

<pallas_src>
import functools
import math

import jax
import jax.numpy as jnp
from jax.experimental import pallas as pl
from jax.experimental.pallas import tpu as pltpu


# ----------------------------- Pallas kernel -----------------------------

def _mlp_kernel(x_ref, w1_ref, b1_ref, w2_ref, b2_ref, o_ref, acc_ref):
    """One (row-tile, hidden-tile) step of fused fc1 -> GELU -> fc2."""
    h_idx = pl.program_id(1)

    @pl.when(h_idx == 0)
    def _():
        acc_ref[...] = jnp.zeros_like(acc_ref)

    # fc1 for this hidden-column tile (MXU, f32 accumulation).
    x = x_ref[...].astype(w1_ref.dtype)
    h = jnp.dot(x, w1_ref[...], preferred_element_type=jnp.float32) + b1_ref[...]

    # Exact (erf-based) GELU == torch.nn.GELU(approximate='none'); kept in f32
    # so the elementwise path is valid on v5e too.
    h = 0.5 * h * (1.0 + jax.lax.erf(h * (1.0 / math.sqrt(2.0))))

    # Partial fc2 contribution of this hidden tile, accumulated in VMEM.
    acc_ref[...] += jnp.dot(
        h.astype(w2_ref.dtype), w2_ref[...], preferred_element_type=jnp.float32
    )

    @pl.when(h_idx == pl.num_programs(1) - 1)
    def _():
        o_ref[...] = (acc_ref[...] + b2_ref[...]).astype(o_ref.dtype)


# ----------------------------- wrapper -----------------------------

def _pick_row_tile(m):
    """Sublane-aligned row tile; prefer >=2 tiles so v7x can use both TCs."""
    if m % 8 != 0:
        return m
    for cand in (256, 128, 64, 32, 16, 8):
        if m % cand == 0 and m // cand >= 2:
            return cand
    return m


def _pick_hidden_tile(h):
    """Lane/MXU-aligned hidden (reduction) tile for weight-DMA pipelining."""
    for cand in (512, 256, 128):
        if h % cand == 0:
            return cand
    return h


def mlp_pallas(x, w1, b1, w2, b2, *, weight_dtype=None):
    """Fused MLP: fc2(GELU(fc1(x))).  x: (..., in_features)."""
    *lead, K = x.shape
    M = int(math.prod(lead)) if lead else 1
    H = w1.shape[1]
    N = w2.shape[1]
    assert w1.shape == (K, H) and w2.shape == (H, N)

    x2d = x.reshape(M, K)
    if weight_dtype is not None:
        w1 = w1.astype(weight_dtype)
        w2 = w2.astype(weight_dtype)
    b1_2d = b1.reshape(1, H).astype(jnp.float32)
    b2_2d = b2.reshape(1, N).astype(jnp.float32)

    tm = _pick_row_tile(M)
    th = _pick_hidden_tile(H)
    grid = (M // tm, H // th)
    # TODO(synk): very large out_features would also want an N grid axis; the
    # transformer-MLP sizes targeted here keep the full (tm, N) tile in VMEM.

    out2d = pl.pallas_call(
        _mlp_kernel,
        grid=grid,
        out_shape=jax.ShapeDtypeStruct((M, N), x.dtype),
        in_specs=[
            pl.BlockSpec((tm, K), lambda i, h: (i, 0)),   # activations (reused over h)
            pl.BlockSpec((K, th), lambda i, h: (0, h)),   # fc1 weight column tile
            pl.BlockSpec((1, th), lambda i, h: (0, h)),   # fc1 bias tile
            pl.BlockSpec((th, N), lambda i, h: (h, 0)),   # fc2 weight row tile
            pl.BlockSpec((1, N), lambda i, h: (0, 0)),    # fc2 bias
        ],
        out_specs=pl.BlockSpec((tm, N), lambda i, h: (i, 0)),
        scratch_shapes=[pltpu.VMEM((tm, N), jnp.float32)],
        compiler_params=pltpu.CompilerParams(
            dimension_semantics=("parallel", "arbitrary")
        ),
    )(x2d, w1, b1_2d, w2, b2_2d)
    return out2d.reshape(*lead, N)


# ----------------------------- reference -----------------------------

def mlp_reference(x, w1, b1, w2, b2):
    hp = jax.lax.Precision.HIGHEST
    h = jnp.dot(x, w1, precision=hp) + b1
    h = 0.5 * h * (1.0 + jax.lax.erf(h * (1.0 / math.sqrt(2.0))))
    return jnp.dot(h, w2, precision=hp) + b2


# ----------------------------- main -----------------------------

if __name__ == "__main__":
    B, S = 2, 8
    in_features = 256
    hidden_features = 1024   # 4x expansion, as in the transformer MLP
    out_features = 256

    key = jax.random.PRNGKey(0)
    kx, k1, k2, k3, k4 = jax.random.split(key, 5)
    x = jax.random.normal(kx, (B, S, in_features), jnp.float32)
    w1 = jax.random.normal(k1, (in_features, hidden_features), jnp.float32) * 0.02
    b1 = jax.random.normal(k2, (hidden_features,), jnp.float32) * 0.02
    w2 = jax.random.normal(k3, (hidden_features, out_features), jnp.float32) * 0.02
    b2 = jax.random.normal(k4, (out_features,), jnp.float32) * 0.02

    ref = mlp_reference(x, w1, b1, w2, b2)

    # f32 path (exact semantics of the PyTorch module).
    fwd = jax.jit(mlp_pallas)
    out = fwd(x, w1, b1, w2, b2)
    jax.block_until_ready(out)
    assert out.shape == (B, S, out_features), out.shape
    assert jnp.all(jnp.isfinite(out))
    assert jnp.allclose(out, ref, rtol=2e-3, atol=2e-3), float(
        jnp.max(jnp.abs(out - ref)))

    # bf16-weight fast path (halves weight HBM traffic; f32 accumulation).
    fwd_bf16 = jax.jit(functools.partial(mlp_pallas, weight_dtype=jnp.bfloat16))
    out_bf16 = fwd_bf16(x, w1, b1, w2, b2)
    jax.block_until_ready(out_bf16)
    assert jnp.allclose(out_bf16, ref, rtol=5e-2, atol=5e-2), float(
        jnp.max(jnp.abs(out_bf16 - ref)))

    print("KERNEL_OK")
</pallas_src>

<mosaic_0001>
module attributes {stable_mosaic.version = 11 : i64} {
  func.func @_mlp_kernel(%arg0: i32, %arg1: i32, %arg2: memref<8x256xf32, #tpu.memory_space<vmem>>, %arg3: memref<256x512xf32, #tpu.memory_space<vmem>>, %arg4: memref<1x512xf32, #tpu.memory_space<vmem>>, %arg5: memref<512x256xf32, #tpu.memory_space<vmem>>, %arg6: memref<1x256xf32, #tpu.memory_space<vmem>>, %arg7: memref<8x256xf32, #tpu.memory_space<vmem>>, %arg8: memref<8x256xf32, #tpu.memory_space<vmem>>) attributes {dimension_semantics = [#tpu.dimension_semantics<parallel>, #tpu.dimension_semantics<arbitrary>], iteration_bounds = array<i64: 2, 2>, scalar_prefetch = 0 : i64, scratch_operands = 1 : i64, tpu.core_type = #tpu.core_type<tc>, window_params = [{transform_indices = @transform_0, window_bounds = array<i64: 8, 256>}, {transform_indices = @transform_1, window_bounds = array<i64: 256, 512>}, {transform_indices = @transform_2, window_bounds = array<i64: 1, 512>}, {transform_indices = @transform_3, window_bounds = array<i64: 512, 256>}, {pipeline_mode = #tpu.pipeline_mode<synchronous>, transform_indices = @transform_4, window_bounds = array<i64: 1, 256>}, {transform_indices = @transform_5, window_bounds = array<i64: 8, 256>}]} {
    %c0_i32 = arith.constant 0 : i32
    %0 = arith.cmpi eq, %arg1, %c0_i32 : i32
    %1 = arith.extui %0 : i1 to i32
    %c0_i32_0 = arith.constant 0 : i32
    %2 = arith.cmpi ne, %1, %c0_i32_0 : i32
    scf.if %2 {
      %cst_17 = arith.constant 0.000000e+00 : f32
      %25 = vector.broadcast %cst_17 : f32 to vector<8x256xf32>
      %c0_18 = arith.constant 0 : index
      %c0_19 = arith.constant 0 : index
      %26 = vector.load %arg8[%c0_18, %c0_19] : memref<8x256xf32, #tpu.memory_space<vmem>>, vector<8x256xf32>
      tpu.vector_store %arg8[%c0_18, %c0_19], %25 {strides = array<i32>} : memref<8x256xf32, #tpu.memory_space<vmem>>, vector<8x256xf32>,
    } else {
    }
    %c0 = arith.constant 0 : index
    %c0_1 = arith.constant 0 : index
    %3 = vector.load %arg2[%c0, %c0_1] : memref<8x256xf32, #tpu.memory_space<vmem>>, vector<8x256xf32>
    %c0_2 = arith.constant 0 : index
    %c0_3 = arith.constant 0 : index
    %4 = vector.load %arg3[%c0_2, %c0_3] : memref<256x512xf32, #tpu.memory_space<vmem>>, vector<256x512xf32>
    %cst = arith.constant dense<0.000000e+00> : vector<8x512xf32>
    %5 = tpu.matmul %3, %4, %cst {dimension_numbers = #tpu.dot_dimension_numbers<[1], [0], [0], [1], [0, 0, 1, 1], [], []>} : vector<8x256xf32>, vector<256x512xf32>, vector<8x512xf32> -> vector<8x512xf32>
    %c0_4 = arith.constant 0 : index
    %c0_5 = arith.constant 0 : index
    %6 = vector.load %arg4[%c0_4, %c0_5] : memref<1x512xf32, #tpu.memory_space<vmem>>, vector<1x512xf32>
    %7 = vector.broadcast %6 : vector<1x512xf32> to vector<8x512xf32>
    %8 = arith.addf %5, %7 : vector<8x512xf32>
    %cst_6 = arith.constant 5.000000e-01 : f32
    %9 = vector.broadcast %cst_6 : f32 to vector<8x512xf32>
    %10 = arith.mulf %9, %8 : vector<8x512xf32>
    %cst_7 = arith.constant 0.707106769 : f32
    %11 = vector.broadcast %cst_7 : f32 to vector<8x512xf32>
    %12 = arith.mulf %8, %11 : vector<8x512xf32>
    %13 = math.erf %12 : vector<8x512xf32>
    %cst_8 = arith.constant 1.000000e+00 : f32
    %14 = vector.broadcast %cst_8 : f32 to vector<8x512xf32>
    %15 = arith.addf %14, %13 : vector<8x512xf32>
    %16 = arith.mulf %10, %15 : vector<8x512xf32>
    %c0_9 = arith.constant 0 : index
    %c0_10 = arith.constant 0 : index
    %17 = vector.load %arg8[%c0_9, %c0_10] : memref<8x256xf32, #tpu.memory_space<vmem>>, vector<8x256xf32>
    %c0_11 = arith.constant 0 : index
    %c0_12 = arith.constant 0 : index
    %18 = vector.load %arg5[%c0_11, %c0_12] : memref<512x256xf32, #tpu.memory_space<vmem>>, vector<512x256xf32>
    %cst_13 = arith.constant dense<0.000000e+00> : vector<8x256xf32>
    %19 = tpu.matmul %16, %18, %cst_13 {dimension_numbers = #tpu.dot_dimension_numbers<[1], [0], [0], [1], [0, 0, 1, 1], [], []>} : vector<8x512xf32>, vector<512x256xf32>, vector<8x256xf32> -> vector<8x256xf32>
    %20 = arith.addf %17, %19 : vector<8x256xf32>
    %c0_14 = arith.constant 0 : index
    %c0_15 = arith.constant 0 : index
    %21 = vector.load %arg8[%c0_14, %c0_15] : memref<8x256xf32, #tpu.memory_space<vmem>>, vector<8x256xf32>
    tpu.vector_store %arg8[%c0_14, %c0_15], %20 {strides = array<i32>} : memref<8x256xf32, #tpu.memory_space<vmem>>, vector<8x256xf32>,
    %c1_i32 = arith.constant 1 : i32
    %22 = arith.cmpi eq, %arg1, %c1_i32 : i32
    %23 = arith.extui %22 : i1 to i32
    %c0_i32_16 = arith.constant 0 : i32
    %24 = arith.cmpi ne, %23, %c0_i32_16 : i32
    scf.if %24 {
      %c0_17 = arith.constant 0 : index
      %c0_18 = arith.constant 0 : index
      %25 = vector.load %arg8[%c0_17, %c0_18] : memref<8x256xf32, #tpu.memory_space<vmem>>, vector<8x256xf32>
      %c0_19 = arith.constant 0 : index
      %c0_20 = arith.constant 0 : index
      %26 = vector.load %arg6[%c0_19, %c0_20] : memref<1x256xf32, #tpu.memory_space<vmem>>, vector<1x256xf32>
      %27 = vector.broadcast %26 : vector<1x256xf32> to vector<8x256xf32>
      %28 = arith.addf %25, %27 : vector<8x256xf32>
      %c0_21 = arith.constant 0 : index
      %c0_22 = arith.constant 0 : index
      %29 = vector.load %arg7[%c0_21, %c0_22] : memref<8x256xf32, #tpu.memory_space<vmem>>, vector<8x256xf32>
      tpu.vector_store %arg7[%c0_21, %c0_22], %28 {strides = array<i32>} : memref<8x256xf32, #tpu.memory_space<vmem>>, vector<8x256xf32>,
    } else {
    }
    return
  }
  func.func @transform_0(%arg0: i32, %arg1: i32) -> (i32, i32) {
    %c0_i32 = arith.constant 0 : i32
    %c0_i32_0 = arith.constant 0 : i32
    return %arg0, %c0_i32 : i32, i32
  }
  func.func @transform_1(%arg0: i32, %arg1: i32) -> (i32, i32) {
    %c0_i32 = arith.constant 0 : i32
    %c0_i32_0 = arith.constant 0 : i32
    return %c0_i32, %arg1 : i32, i32
  }
  func.func @transform_2(%arg0: i32, %arg1: i32) -> (i32, i32) {
    %c0_i32 = arith.constant 0 : i32
    %c0_i32_0 = arith.constant 0 : i32
    return %c0_i32, %arg1 : i32, i32
  }
  func.func @transform_3(%arg0: i32, %arg1: i32) -> (i32, i32) {
    %c0_i32 = arith.constant 0 : i32
    %c0_i32_0 = arith.constant 0 : i32
    return %arg1, %c0_i32 : i32, i32
  }
  func.func @transform_4(%arg0: i32, %arg1: i32) -> (i32, i32) {
    %c0_i32 = arith.constant 0 : i32
    %c0_i32_0 = arith.constant 0 : i32
    %c0_i32_1 = arith.constant 0 : i32
    return %c0_i32, %c0_i32_0 : i32, i32
  }
  func.func @transform_5(%arg0: i32, %arg1: i32) -> (i32, i32) {
    %c0_i32 = arith.constant 0 : i32
    %c0_i32_0 = arith.constant 0 : i32
    return %arg0, %c0_i32 : i32, i32
  }
}

</mosaic_0001>

<bundles_post_ra>
// kernel: mlp_pallas.1
= control target key start
LH: loop header
LB: loop body
LE: loop exit
PB: predicated region body
PF: predicated region fallthrough
CT: control target
= control target key end

     0   :  { %s2440_s0 = inlined_call_operand.hbm [shape: f32[16,256], index: 0, kind: input, shape index: {}]   ;;  %s2441_s1 = inlined_call_operand.hbm [shape: f32[256,1024], index: 1, kind: input, shape index: {}]   ;;  %s2442_s2 = inlined_call_operand.vmem [shape: f32[1,1024], index: 2, kind: input, shape index: {}]   ;;  %s2443_s3 = inlined_call_operand.hbm [shape: f32[1024,256], index: 3, kind: input, shape index: {}]   ;;  %s2444_s4 = inlined_call_operand.vmem [shape: f32[1,256], index: 4, kind: input, shape index: {}]   ;;  %s2445_s5 = inlined_call_operand.hbm [shape: f32[16,256], index: 5, kind: output, shape index: {}]  }
   0x1   :  { %2456 = sst [smem:[#allocation20_spill]] %s2441_s1 }
   0x2   :  { %2457 = sst [smem:[#allocation21_spill]] %s2442_s2 }
   0x3   :  { %2458 = sst [smem:[#allocation22_spill]] %s2444_s4 }
   0x4   :  { %2459 = sst [smem:[#allocation23_spill]] %s2445_s5 }
   0x5   :  { %10 = vsyncpa [#allocation4], 0 }
   0x6   :  { %12 = vsyncpa [#allocation4 + $0x1], 0 }
   0x7   :  { %13 = vsyncpa [#allocation7], 0 }
   0x8   :  { %15 = vsyncpa [#allocation7 + $0x1], 0 }
   0x9   :  { %16 = vsyncpa [#allocation5], 0 }
   0xa   :  { %18 = vsyncpa [#allocation5 + $0x1], 0  ;;  %s1792_s18 = smov 0   ;;  %s1794_s19 = smov 0  }
   0xb   :  { %s1796_s20 = smov 0   ;;  %s1798_s21 = smov 0  }
   0xc   :  { %s1800_s22 = smov 0   ;;  %s1802_s23 = smov 0  }
   0xd   :  { %s1804_s24 = smov 0   ;;  %s1806_s25 = smov 0  }
   0xe   :  { %s1808_s26 = smov 0   ;;  %s1810_s27 = smov 0  }
   0xf   :  { %s1812_s28 = smov 0  }
  0x10 LB: > { %2460 = sst [smem:[#allocation13_spill]] %s1730_s23  ;;  %p51_p0 = scmp.eq.s32.totalorder %s1750_s28, 0  ;;  %s1750_s28 = sphi %s1812_s28, %s24_s28   ;;  %s1746_s27 = sphi %s1810_s27, %s2495_s27   ;;  %s1742_s26 = sphi %s1808_s26, %s2502_s26   ;;  %s1738_s25 = sphi %s1806_s25, %s2493_s25   ;;  %s1734_s24 = sphi %s1804_s24, %s2501_s24   ;;  %s1730_s23 = sphi %s1802_s23, %s2492_s23   ;;  %s1726_s22 = sphi %s1800_s22, %s2500_s22   ;;  %s1722_s21 = sphi %s1798_s21, %s2499_s21   ;;  %s1718_s20 = sphi %s1796_s20, %s2498_s20   ;;  %s1714_s19 = sphi %s1794_s19, %s2497_s19   ;;  %s1710_s18 = sphi %s1792_s18, %s2496_s18  }
  0x11   : > { %2461 = sst [smem:[#allocation14_spill]] %s1738_s25  ;;  %p76_p1 = scmp.ne.s32.totalorder %s1718_s20, %s1714_s19 }
  0x12   : > { %2462 = sst [smem:[#allocation15_spill]] %s1746_s27  ;;  %p2446_p2 = scmp.lt.s32.totalorder %s1750_s28, 4 }
  0x13   : > { %s227_s30 = sand.u32 1, %s1750_s28   ;;  %p78_p3 = por %p76_p1, %p51_p0 }
  0x14   : > { %s229_s6 = sand.u32 1, %s1718_s20   ;;  %s1146_s7 = sshll.u32 %s1742_s26, 9 }
  0x15   : > { %s1857_s8 = sshll.u32 %s229_s6, 10  ;;  %s2463_s1 = sld [smem:[#allocation20_spill]] }
  0x16   : > { %p1866_p4 = pnand %p2446_p2, %p78_p3  ;;  %s231_s13 = scalar_lea.vmem [#allocation6], %s1857_s8 }
  0x17   : > { %s238_s14 = sshll.u32 %s231_s13, 4  ;;  %s1873_s15 = scalar_lea.sflag [#allocation7], %s227_s30  ;;  %s1871_s14 = int_to_ptr.vmem [resolvable:$true] %s238_s14 }
  0x18   : > { %p2449_p6 = pneg %p1866_p4 }
  0x1b   : > { %s1862_s11 = scalar_lea.hbm %s2463_s1, %s1146_s7  ;;  %s1539_s7 = scalar_lea.hbm %s2463_s1, 32768 }
  0x1c   : > { %s1534_s16 = scalar_lea.hbm %s1862_s11, 16384  ;;  %p1540_p9 = scmp.lt.u32.totalorder %s1862_s11, %s2463_s1 }
  0x1d   : > { %p1535_p5 = scmp.ne.s32.totalorder %s1862_s11, %s1534_s16  ;;  %p1541_p10 = scmp.lt.u32.totalorder %s1539_s7, %s1534_s16 }
  0x1e   : > { %p1543_p12 = scmp.lt.u32.totalorder %s1534_s16, %s1862_s11 }
  0x1f   : > { %p1537_p7 = pnand %p2449_p6, %p1535_p5  ;;  %p1542_p11 = por %p1541_p10, %p1540_p9 }
  0x21   : > { %p1538_p8 = pneg %p1537_p7  ;;  %p1544_p13 = por %p1543_p12, %p1542_p11 }
  0x23   : > { %p1545_p1 = pnand %p1544_p13, %p1538_p8 }
  0x25   : > { %1548 = shalt.err (!%p1545_p1)
}
  0x26   : > { %s1549_s30 = scalar_lea.vmem %s1871_s14, 16384  ;;  %s1752_s13 = smov [#allocation6]  }
  0x27   : > { %p1550_p3 = scmp.ne.s32.totalorder %s1871_s14, %s1549_s30  ;;  %s1554_s17 = sshll.u32 %s1752_s13, 4  ;;  %s1555_s17 = int_to_ptr.vmem [resolvable:$false] %s1554_s17 }
  0x28   : > { %s1556_s6 = scalar_lea.vmem %s1555_s17, 32768  ;;  %p1557_p2 = scmp.lt.s32.totalorder %s1871_s14, %s1555_s17 }
  0x29   : > { %p1552_p5 = pnand %p1550_p3, %p2449_p6  ;;  %p1558_p9 = scmp.lt.s32.totalorder %s1556_s6, %s1549_s30 }
  0x2b   : > { %p1553_p7 = pneg %p1552_p5  ;;  %p1559_p10 = por %p1558_p9, %p1557_p2 }
  0x2d   : > { %p1560_p11 = pnand %p1559_p10, %p1553_p7 }
  0x2f   : > { %1563 = shalt.err (!%p1560_p11)
}
  0x30   : > { %s1753_s16 = smov 1024   ;;  %s1754_s7 = smov 512  }
  0x31   : > { %s1755_s9 = smov 32   ;;  %p1132_p2 = scmp.ge.s32.totalorder %s1750_s28, 1 }
  0x32   : > { %1422 = dma.hbm_to_vmem [thread:$0]  (!%p1866_p4), %s1862_s11, 16384, %s1871_s14, %s1873_s15, %s1753_s16, %s1754_s7, %s1755_s9  }
  0x33   : > { %p276_p8 = scmp.lt.s32.totalorder %s1750_s28, 5  ;;  %s1908_s30 = sadd.s32 4294967295, %s1750_s28  }
  0x34   : > { %s1119_s13 = sadd.s32 4294967294, %s1750_s28   ;;  %s33_s17 = sadd.s32 1, %s1742_s26 }
  0x35   : > { %p1903_p12 = pnand %p1132_p2, %p276_p8  ;;  %p34_p13 = scmp.ge.s32.totalorder %s33_s17, 2 }
  0x36   : > { %s36_s6 = sadd.s32 1, %s1746_s27  ;;  %s43_s11 = sadd.s32 1, %s1730_s23 }
  0x37   : > { %s2465_s10 = scalar_select %p1903_p12, 1, 0 }
  0x38   : > { %p50_p1 = scmp.ne.s32.totalorder %s1730_s23, %s1726_s22  ;;  %s2504_s17 = smov (%p34_p13, %s33_s17), 0 }
  0x39   : > { %2466 = sst [smem:[#allocation16_spill]] %s2504_s17  ;;  %s2506_s6 = smov (!%p34_p13, %s36_s6), %s1746_s27 }
  0x3a   : > { %p1924_p3 = por %p51_p0, %p50_p1  ;;  %p56_p5 = scmp.ne.s32.totalorder %s1726_s22, %s1722_s21 }
  0x3b   : > { %p38_p7 = scmp.ge.s32.totalorder %s2506_s6, 2  ;;  %p57_p9 = scmp.eq.s32.totalorder %s1908_s30, 0 }
  0x3c   : > { %s66_s16 = ssub.s32 %s1742_s26, %s2504_s17  ;;  %p82_p10 = scmp.ne.s32.totalorder %s1714_s19, %s1710_s18 }
  0x3d   : > { %s2508_s6 = smov (%p38_p7, %s2506_s6), 0  ;;  %p1940_p11 = por %p57_p9, %p56_p5 }
  0x3e   : > { %2468 = sst [smem:[#allocation17_spill]] %s2508_s6  ;;  %p67_p0 = scmp.eq.s32.totalorder %s66_s16, 0 }
  0x3f   : > { %s2469_s7 = scalar_select %p1940_p11, 1, 0 }
  0x40   : > { %s40_s9 = ssub.s32 %s1746_s27, %s2508_s6  ;;  %p1946_p2 = por %p82_p10, %p57_p9 }
  0x41   : > { %p41_p8 = scmp.eq.s32.totalorder %s40_s9, 0  ;;  %p179_p13 = scmp.eq.s32.totalorder %s1908_s30, 3 }
  0x42   : > { %s2470_s29 = scalar_select %p1946_p2, 1, 0 }
  0x43   : > { %s2471_s1 = sadd.s32 1, %s1718_s20  ;;  %p1962_p7 = por %p179_p13, %p50_p1 }
  0x44   : > { %s1954_s18 = scalar_select %p67_p0, %s1718_s20, %s2471_s1  }
  0x45   : > { %s1957_s17 = scalar_select %p41_p8, %s1730_s23, %s43_s11  }
  0x46   : > { %2472 = sst [smem:[#allocation18_spill]] %s1954_s18  ;;  %p185_p6 = scmp.eq.s32.totalorder %s1119_s13, 3 }
  0x47   : > { %2473 = sst [smem:[#allocation19_spill]] %s1957_s17  ;;  %s208_s25 = sand.u32 1, %s1730_s23  }
  0x48   : > { %s2474_s5 = scalar_select %p1962_p7, 1, 0 }
  0x49   : > { %s1145_s16 = sshll.u32 %s1746_s27, 8  ;;  %p1971_p9 = por %p185_p6, %p56_p5 }
  0x4a   : > { %s1122_s9 = sshll.u32 %s208_s25, 4  ;;  %s1978_s1 = scalar_lea.hbm %s2440_s0, %s1145_s16 }
  0x4b   : > { %s2475_s6 = scalar_select %p1971_p9, 1, 0 }
  0x4c   : > { %p2476_p10 = scmp.lt.s32.totalorder %s1750_s28, 4  ;;  %s212_s11 = scalar_lea.vmem [#allocation3], %s1122_s9 }
  0x4d   : > { %s220_s27 = sshll.u32 %s212_s11, 4  ;;  %s209_s17 = scalar_lea.sflag [#allocation4], %s208_s25  ;;  %s1988_s27 = int_to_ptr.vmem [resolvable:$true] %s220_s27 }
  0x4e   : > { %p1984_p1 = pnand %p2476_p10, %p1924_p3  ;;  %s1564_s2 = scalar_lea.hbm %s1978_s1, 256 }
  0x4f   : > { %p1565_p6 = scmp.ne.s32.totalorder %s1978_s1, %s1564_s2  ;;  %s1569_s16 = scalar_lea.hbm %s2440_s0, 512 }
  0x50   : > { %p1566_p5 = pneg %p1984_p1  ;;  %p1570_p3 = scmp.lt.u32.totalorder %s1978_s1, %s2440_s0 }
  0x51   : > { %p1571_p13 = scmp.lt.u32.totalorder %s1569_s16, %s1564_s2  ;;  %p1573_p9 = scmp.lt.u32.totalorder %s1564_s2, %s1978_s1 }
  0x52   : > { %p1567_p0 = pnand %p1566_p5, %p1565_p6 }
  0x53   : > { %p1572_p10 = por %p1571_p13, %p1570_p3 }
  0x54   : > { %p1568_p8 = pneg %p1567_p0 }
  0x55   : > { %p1574_p7 = por %p1573_p9, %p1572_p10 }
  0x57   : > { %p1575_p2 = pnand %p1574_p7, %p1568_p8 }
  0x59   : > { %1578 = shalt.err (!%p1575_p2)
}
  0x5a   : > { %s1579_s25 = scalar_lea.vmem %s1988_s27, 256  ;;  %s1756_s9 = smov [#allocation3]  }
  0x5b   : > { %p1580_p6 = scmp.ne.s32.totalorder %s1988_s27, %s1579_s25  ;;  %s1584_s11 = sshll.u32 %s1756_s9, 4  ;;  %s1585_s11 = int_to_ptr.vmem [resolvable:$false] %s1584_s11 }
  0x5c   : > { %s1586_s23 = scalar_lea.vmem %s1585_s11, 512  ;;  %p1587_p12 = scmp.lt.s32.totalorder %s1988_s27, %s1585_s11 }
  0x5d   : > { %p1582_p0 = pnand %p1580_p6, %p1566_p5  ;;  %p1588_p3 = scmp.lt.s32.totalorder %s1586_s23, %s1579_s25 }
  0x5f   : > { %p1583_p11 = pneg %p1582_p0  ;;  %p1589_p13 = por %p1588_p3, %p1587_p12 }
  0x61   : > { %p1590_p9 = pnand %p1589_p13, %p1583_p11 }
  0x63   : > { %1593 = shalt.err (!%p1590_p9)
}
  0x64   : > { %1419 = dma.hbm_to_vmem [thread:$0]  (!%p1984_p1), %s1978_s1, 256, %s1988_s27, %s209_s17  }
  0x65   : > { %s1148_s18 = sshll.u32 %s1742_s26, 14  ;;  %s260_s2 = scalar_lea.vmem [#allocation8], %s1857_s8 }
  0x66   : > { %s268_s4 = sshll.u32 %s260_s2, 4  ;;  %s2020_s9 = scalar_lea.hbm %s2443_s3, %s1148_s18  ;;  %s2022_s4 = int_to_ptr.vmem [resolvable:$true] %s268_s4 }
  0x67   : > { %s1594_s13 = scalar_lea.hbm %s2020_s9, 16384  ;;  %p2478_p11 = pneg %p1866_p4 }
  0x68   : > { %p1595_p12 = scmp.ne.s32.totalorder %s2020_s9, %s1594_s13  ;;  %s1599_s17 = scalar_lea.hbm %s2443_s3, 32768 }
  0x69   : > { %p1600_p1 = scmp.lt.u32.totalorder %s2020_s9, %s2443_s3  ;;  %p1601_p5 = scmp.lt.u32.totalorder %s1599_s17, %s1594_s13 }
  0x6a   : > { %p1597_p2 = pnand %p1595_p12, %p2478_p11  ;;  %p1603_p10 = scmp.lt.u32.totalorder %s1594_s13, %s2020_s9 }
  0x6b   : > { %p1602_p8 = por %p1601_p5, %p1600_p1 }
  0x6c   : > { %p1598_p7 = pneg %p1597_p2 }
  0x6d   : > { %p1604_p6 = por %p1603_p10, %p1602_p8 }
  0x6f   : > { %p1605_p0 = pnand %p1604_p6, %p1598_p7 }
  0x71   : > { %1608 = shalt.err (!%p1605_p0)
}
  0x72   : > { %s1609_s11 = scalar_lea.vmem %s2022_s4, 16384  ;;  %p2479_p13 = pmov %p2478_p11 }
  0x73   : > { %p1610_p3 = scmp.ne.s32.totalorder %s2022_s4, %s1609_s11  ;;  %s1757_s23 = smov [#allocation8]  }
  0x74   : > { %s1614_s18 = sshll.u32 %s1757_s23, 4  ;;  %s1615_s18 = int_to_ptr.vmem [resolvable:$false] %s1614_s18 }
  0x75   : > { %p1612_p9 = pnand %p1610_p3, %p2479_p13  ;;  %s1616_s2 = scalar_lea.vmem %s1615_s18, 32768 }
  0x76   : > { %p1617_p11 = scmp.lt.s32.totalorder %s2022_s4, %s1615_s18  ;;  %p1618_p2 = scmp.lt.s32.totalorder %s1616_s2, %s1609_s11 }
  0x77   : > { %p1613_p12 = pneg %p1612_p9 }
  0x78   : > { %p1619_p1 = por %p1618_p2, %p1617_p11 }
  0x7a   : > { %p1620_p5 = pnand %p1619_p1, %p1613_p12 }
  0x7c   : > { %1623 = shalt.err (!%p1620_p5)
}
  0x7d   : > { %s1758_s14 = smov 256   ;;  %s1759_s16 = smov 16  }
  0x7e   : > { %1425 = dma.hbm_to_vmem [thread:$0]  (!%p1866_p4), %s2020_s9, 16384, %s2022_s4, %s1873_s15, %s1758_s14, %s1758_s14, %s1759_s16  }
  0x7f   : > { %p2480_p7 = scmp.ne.s32.totalorder %s2465_s10, 0 }
  0x80   : > { %s2051_s13 = sand.u32 (!%p2480_p7), 1, %s1726_s22   ;;  %p2481_p8 = scmp.ne.s32.totalorder (!%p2480_p7), %s2469_s7, 0 }
  0x81   : > { %280 = sbr.rel (%p2480_p7) target bundleno = 771 (0x303), region = 40  ;;  %s1133_s27 = sshll.u32 (!%p2480_p7), %s2051_s13, 4 }
  0x82   : > { %s283_s8 = scalar_lea.sflag (!%p2480_p7), [#allocation4], %s2051_s13  ;;  %s2055_s17 = scalar_lea.vmem (!%p2480_p7), [#allocation3], %s1133_s27 }
  0x88   : > { %1697 = dma.done.wait (%p2481_p8), %s283_s8, 256  }
  0x89   : > { %1699 = vsyncadd (%p2481_p8), %s283_s8, 4294967040  ;;  %s291_s12 = sand.u32 1, %s1908_s30   ;;  %s293_s15 = sand.u32 1, %s1714_s19  }
  0x8a   : > { %s1134_s10 = sshll.u32 %s293_s15, 10  ;;  %s292_s4 = scalar_lea.sflag [#allocation7], %s291_s12 }
  0x8b   : > { %s2063_s9 = scalar_lea.vmem [#allocation6], %s1134_s10  ;;  %p2482_p4 = scmp.ne.s32.totalorder %s2470_s29, 0 }
  0x8d   : > { %1701 = dma.done.wait (%p2482_p4), %s292_s4, 32768  }
  0x8e   : > { %1703 = vsyncadd (%p2482_p4), %s292_s4, 4294934528  ;;  %s1137_s1 = sshll.u32 %s1734_s24, 2  ;;  %s2483_s11 = sld [smem:[#allocation21_spill]] }
  0x8f   : > { %p347_p10 = scmp.lt.s32.totalorder %s1137_s1, 7  ;;  %s2076_s23 = scalar_lea.vmem [#allocation8], %s1134_s10 }
  0x90   : > { %s2078_s18 = scalar_lea.vmem [#allocation9], %s1133_s27  ;;  %p1138_p6 = scmp.ne.s32.totalorder %s1734_s24, 0 }
  0x91   : > { %s2510_s1 = smov (!%p347_p10, %s1137_s1), 7  ;;  %v1760_v0 = vmov (!%p1138_p6), 0.0  }
  0x92   : > { %355 = sbr.rel (%p1138_p6) target bundleno = 153 (0x99), region = 56  ;;  %356 = vst [vmem:[#allocation2] sm:$0xff] (!%p1138_p6), %v1760_v0  ;;  %357 = vst [vmem:[#allocation2 + $0x8] sm:$0xff] (!%p1138_p6), %v1760_v0 }
  0x94   : > { %s349_s30 = scalar_lea.vmem %s2483_s11, %s2510_s1 }
  0x99 PF: > { %v361_v1 = vld [vmem:[%s2063_s9 + $0x8] sm:$0xff]  ;;  %v360_v3 = vld [vmem:[%s2063_s9] sm:$0xff]  ;;  %p1139_p0 = scmp.ne.s32.totalorder %s1734_s24, 1 }
  0x9a   : > { %v365_v2 = vld [vmem:[%s2063_s9 + $0x28] sm:$0xff]  ;;  %v364_v5 = vld [vmem:[%s2063_s9 + $0x20] sm:$0xff]  ;;  %s2485_s8 = sld [smem:[#allocation22_spill]] (!%p1139_p0) }
  0x9b   : > { %v1150_v4 = vpack.c.bf16 %v365_v2, %v361_v1  ;;  %v369_v6 = vld [vmem:[%s2063_s9 + $0x48] sm:$0xff]  ;;  %v1152_v8 = vpack.c.bf16 %v364_v5, %v360_v3  ;;  %v368_v10 = vld [vmem:[%s2063_s9 + $0x40] sm:$0xff] }
  0x9c   : > { %v373_v7 = vld [vmem:[%s2063_s9 + $0x68] sm:$0xff]  ;;  %v372_v11 = vld [vmem:[%s2063_s9 + $0x60] sm:$0xff] }
  0x9d   : > { %v1154_v9 = vpack.c.bf16 %v373_v7, %v369_v6  ;;  %v377_v12 = vld [vmem:[%s2063_s9 + $0x88] sm:$0xff]  ;;  %1151 = vmatprep.subr.bf16.mxu1 %v1150_v4  ;;  %v1156_v14 = vpack.c.bf16 %v372_v11, %v368_v10  ;;  %v376_v16 = vld [vmem:[%s2063_s9 + $0x80] sm:$0xff] }
  0x9e   : > { %v381_v13 = vld [vmem:[%s2063_s9 + $0xa8] sm:$0xff]  ;;  %1153 = vmatpush1.bf16.msra.mxu1 %v1152_v8  ;;  %v380_v17 = vld [vmem:[%s2063_s9 + $0xa0] sm:$0xff] }
  0x9f   : > { %1155 = vmatprep.subr.bf16.mxu1 %v1154_v9  ;;  %v1158_v15 = vpack.c.bf16 %v381_v13, %v377_v12  ;;  %v385_v18 = vld [vmem:[%s2063_s9 + $0xc8] sm:$0xff]  ;;  %v1160_v20 = vpack.c.bf16 %v380_v17, %v376_v16  ;;  %v384_v22 = vld [vmem:[%s2063_s9 + $0xc0] sm:$0xff] }
  0xa0   : > { %v389_v19 = vld [vmem:[%s2063_s9 + $0xe8] sm:$0xff]  ;;  %v388_v23 = vld [vmem:[%s2063_s9 + $0xe0] sm:$0xff] }
  0xa1   : > { %v1162_v21 = vpack.c.bf16 %v389_v19, %v385_v18  ;;  %v393_v24 = vld [vmem:[%s2063_s9 + $0x108] sm:$0xff]  ;;  %v1164_v26 = vpack.c.bf16 %v388_v23, %v384_v22  ;;  %v392_v28 = vld [vmem:[%s2063_s9 + $0x100] sm:$0xff]  ;;  %v676_v19 = vld [vmem:[%s2076_s23 + $0x10] sm:$0xff] }
  0xa2   : > { %1157 = vmatpush1.bf16.msra.mxu1 %v1156_v14  ;;  %v397_v25 = vld [vmem:[%s2063_s9 + $0x128] sm:$0xff]  ;;  %v396_v29 = vld [vmem:[%s2063_s9 + $0x120] sm:$0xff]  ;;  %v677_v14 = vld [vmem:[%s2076_s23 + $0x18] sm:$0xff] }
  0xa3   : > { %1159 = vmatprep.subr.bf16.mxu1 %v1158_v15  ;;  %v1166_v27 = vpack.c.bf16 %v397_v25, %v393_v24  ;;  %v401_v30 = vld [vmem:[%s2063_s9 + $0x148] sm:$0xff]  ;;  %v1168_v32 = vpack.c.bf16 %v396_v29, %v392_v28  ;;  %v400_v34 = vld [vmem:[%s2063_s9 + $0x140] sm:$0xff]  ;;  %v681_v23 = vld [vmem:[%s2076_s23 + $0x38] sm:$0xff] }
  0xa4   : > { %v405_v31 = vld [vmem:[%s2063_s9 + $0x168] sm:$0xff]  ;;  %v404_v35 = vld [vmem:[%s2063_s9 + $0x160] sm:$0xff]  ;;  %v680_v25 = vld [vmem:[%s2076_s23 + $0x30] sm:$0xff] }
  0xa5   : > { %v1170_v33 = vpack.c.bf16 %v405_v31, %v401_v30  ;;  %v409_v36 = vld [vmem:[%s2063_s9 + $0x188] sm:$0xff]  ;;  %v1172_v38 = vpack.c.bf16 %v404_v35, %v400_v34  ;;  %v408_v40 = vld [vmem:[%s2063_s9 + $0x180] sm:$0xff]  ;;  %v685_v29 = vld [vmem:[%s2076_s23 + $0x58] sm:$0xff] }
  0xa6   : > { %1161 = vmatpush1.bf16.msra.mxu1 %v1160_v20  ;;  %v413_v37 = vld [vmem:[%s2063_s9 + $0x1a8] sm:$0xff]  ;;  %v412_v41 = vld [vmem:[%s2063_s9 + $0x1a0] sm:$0xff]  ;;  %v684_v35 = vld [vmem:[%s2076_s23 + $0x50] sm:$0xff] }
  0xa7   : > { %1163 = vmatprep.subr.bf16.mxu1 %v1162_v21  ;;  %v1174_v39 = vpack.c.bf16 %v413_v37, %v409_v36  ;;  %v2110_v42 = vld [vmem:[%s2055_s17 + $0x8] sm:$0xff]  ;;  %v1176_v45 = vpack.c.bf16 %v412_v41, %v408_v40  ;;  %v416_v47 = vld [vmem:[%s2063_s9 + $0x1c0] sm:$0xff] }
  0xa8   : > { %v417_v43 = vld [vmem:[%s2063_s9 + $0x1c8] sm:$0xff]  ;;  %574 = vmatprep.mubr.f32.mxu1 %v2110_v42  ;;  %v420_v48 = vld [vmem:[%s2063_s9 + $0x1e0] sm:$0xff] }
  0xa9   : > { %v421_v44 = vld [vmem:[%s2063_s9 + $0x1e8] sm:$0xff]  ;;  %v1180_v51 = vpack.c.bf16 %v420_v48, %v416_v47  ;;  %v424_v53 = vld [vmem:[%s2063_s9 + $0x200] sm:$0xff]  ;;  %v688_v48 = vld [vmem:[%s2076_s23 + $0x70] sm:$0xff] }
  0xaa   : > { %1165 = vmatpush1.bf16.msra.mxu1 %v1164_v26  ;;  %v1178_v46 = vpack.c.bf16 %v421_v44, %v417_v43  ;;  %v425_v49 = vld [vmem:[%s2063_s9 + $0x208] sm:$0xff]  ;;  %v428_v54 = vld [vmem:[%s2063_s9 + $0x220] sm:$0xff] }
  0xab   : > { %1167 = vmatprep.subr.bf16.mxu1 %v1166_v27  ;;  %v429_v50 = vld [vmem:[%s2063_s9 + $0x228] sm:$0xff]  ;;  %v1184_v57 = vpack.c.bf16 %v428_v54, %v424_v53  ;;  %v432_v59 = vld [vmem:[%s2063_s9 + $0x240] sm:$0xff] }
  0xac   : > { %v1182_v52 = vpack.c.bf16 %v429_v50, %v425_v49  ;;  %v433_v55 = vld [vmem:[%s2063_s9 + $0x248] sm:$0xff]  ;;  %v436_v60 = vld [vmem:[%s2063_s9 + $0x260] sm:$0xff] }
  0xad   : > { %v437_v56 = vld [vmem:[%s2063_s9 + $0x268] sm:$0xff]  ;;  %v1188_v63 = vpack.c.bf16 %v436_v60, %v432_v59  ;;  %v440_v1 = vld [vmem:[%s2063_s9 + $0x280] sm:$0xff]  ;;  %v692_v60 = vld [vmem:[%s2076_s23 + $0x90] sm:$0xff] }
  0xae   : > { %1169 = vmatpush1.bf16.msra.mxu1 %v1168_v32  ;;  %v1186_v58 = vpack.c.bf16 %v437_v56, %v433_v55  ;;  %v441_v61 = vld [vmem:[%s2063_s9 + $0x288] sm:$0xff]  ;;  %v444_v2 = vld [vmem:[%s2063_s9 + $0x2a0] sm:$0xff] }
  0xaf   : > { %1171 = vmatprep.subr.bf16.mxu1 %v1170_v33  ;;  %v445_v62 = vld [vmem:[%s2063_s9 + $0x2a8] sm:$0xff]  ;;  %v1192_v5 = vpack.c.bf16 %v444_v2, %v440_v1  ;;  %v448_v7 = vld [vmem:[%s2063_s9 + $0x2c0] sm:$0xff]  ;;  %v363_v1 = vld [vmem:[%s2063_s9 + $0x18] sm:$0xff] }
  0xb0   : > { %v1190_v0 = vpack.c.bf16 %v445_v62, %v441_v61  ;;  %v449_v3 = vld [vmem:[%s2063_s9 + $0x2c8] sm:$0xff]  ;;  %v452_v8 = vld [vmem:[%s2063_s9 + $0x2e0] sm:$0xff]  ;;  %v367_v2 = vld [vmem:[%s2063_s9 + $0x38] sm:$0xff] }
  0xb1   : > { %v453_v4 = vld [vmem:[%s2063_s9 + $0x2e8] sm:$0xff]  ;;  %v456_v11 = vld [vmem:[%s2063_s9 + $0x300] sm:$0xff]  ;;  %v1196_v15 = vpack.c.bf16 %v452_v8, %v448_v7  ;;  %v696_v7 = vld [vmem:[%s2076_s23 + $0xb0] sm:$0xff]  ;;  %v1214_v8 = vpack.c.bf16 %v367_v2, %v363_v1 }
  0xb2   : > { %1173 = vmatpush1.bf16.msra.mxu1 %v1172_v38  ;;  %v1194_v6 = vpack.c.bf16 %v453_v4, %v449_v3  ;;  %v457_v9 = vld [vmem:[%s2063_s9 + $0x308] sm:$0xff]  ;;  %v460_v12 = vld [vmem:[%s2063_s9 + $0x320] sm:$0xff] }
  0xb3   : > { %1175 = vmatprep.subr.bf16.mxu1 %v1174_v39  ;;  %v461_v10 = vld [vmem:[%s2063_s9 + $0x328] sm:$0xff]  ;;  %v674_v18 = vld [vmem:[%s2076_s23] sm:$0xff]  ;;  %v1200_v31 = vpack.c.bf16 %v460_v12, %v456_v11  ;;  %v689_v39 = vld [vmem:[%s2076_s23 + $0x78] sm:$0xff] }
  0xb4   : > { %v675_v13 = vld [vmem:[%s2076_s23 + $0x8] sm:$0xff]  ;;  %v1198_v21 = vpack.c.bf16 %v461_v10, %v457_v9  ;;  %v1280_v22 = vpack.c.bf16 %v676_v19, %v674_v18  ;;  %v678_v24 = vld [vmem:[%s2076_s23 + $0x20] sm:$0xff]  ;;  %v362_v9 = vld [vmem:[%s2063_s9 + $0x10] sm:$0xff] }
  0xb5   : > { %v465_v16 = vld [vmem:[%s2063_s9 + $0x348] sm:$0xff]  ;;  %v1278_v17 = vpack.c.bf16 %v677_v14, %v675_v13  ;;  %v1284_v30 = vpack.c.bf16 %v680_v25, %v678_v24  ;;  %v464_v32 = vld [vmem:[%s2063_s9 + $0x340] sm:$0xff]  ;;  %v366_v10 = vld [vmem:[%s2063_s9 + $0x30] sm:$0xff] }
  0xb6   : > { %1177 = vmatpush1.bf16.msra.mxu1 %v1176_v45  ;;  %v679_v20 = vld [vmem:[%s2076_s23 + $0x28] sm:$0xff]  ;;  %v682_v34 = vld [vmem:[%s2076_s23 + $0x40] sm:$0xff]  ;;  %v371_v11 = vld [vmem:[%s2063_s9 + $0x58] sm:$0xff] }
  0xb7   : > { %1179 = vmatprep.subr.bf16.mxu1 %v1178_v46  ;;  %v469_v26 = vld [vmem:[%s2063_s9 + $0x368] sm:$0xff]  ;;  %1279 = vmatprep.subr.bf16.mxu0 %v1278_v17  ;;  %v1282_v27 = vpack.c.bf16 %v681_v23, %v679_v20  ;;  %v468_v37 = vld [vmem:[%s2063_s9 + $0x360] sm:$0xff]  ;;  %v1288_v43 = vpack.c.bf16 %v684_v35, %v682_v34  ;;  %v375_v12 = vld [vmem:[%s2063_s9 + $0x78] sm:$0xff]  ;;  %v1216_v17 = vpack.c.bf16 %v366_v10, %v362_v9 }
  0xb8   : > { %v683_v28 = vld [vmem:[%s2076_s23 + $0x48] sm:$0xff]  ;;  %1281 = vmatpush1.bf16.msra.mxu0 %v1280_v22  ;;  %v1202_v36 = vpack.c.bf16 %v469_v26, %v465_v16  ;;  %v1204_v44 = vpack.c.bf16 %v468_v37, %v464_v32  ;;  %v472_v45 = vld [vmem:[%s2063_s9 + $0x380] sm:$0xff]  ;;  %v701_v14 = vld [vmem:[%s2076_s23 + $0xd8] sm:$0xff] }
  0xb9   : > { %1283 = vmatprep.subr.bf16.mxu0 %v1282_v27  ;;  %v1286_v33 = vpack.c.bf16 %v685_v29, %v683_v28  ;;  %v687_v38 = vld [vmem:[%s2076_s23 + $0x68] sm:$0xff]  ;;  %v686_v47 = vld [vmem:[%s2076_s23 + $0x60] sm:$0xff]  ;;  %v370_v18 = vld [vmem:[%s2063_s9 + $0x50] sm:$0xff] }
  0xba   : > { %1181 = vmatpush1.bf16.msra.mxu1 %v1180_v51  ;;  %v473_v40 = vld [vmem:[%s2063_s9 + $0x388] sm:$0xff]  ;;  %v1290_v46 = vpack.c.bf16 %v689_v39, %v687_v38  ;;  %v476_v50 = vld [vmem:[%s2063_s9 + $0x3a0] sm:$0xff]  ;;  %v1292_v55 = vpack.c.bf16 %v688_v48, %v686_v47  ;;  %v700_v20 = vld [vmem:[%s2076_s23 + $0xd0] sm:$0xff] }
  0xbb   : > { %1183 = vmatprep.subr.bf16.mxu1 %v1182_v52  ;;  %v477_v41 = vld [vmem:[%s2063_s9 + $0x3a8] sm:$0xff]  ;;  %v693_v52 = vld [vmem:[%s2076_s23 + $0x98] sm:$0xff]  ;;  %v1208_v56 = vpack.c.bf16 %v476_v50, %v472_v45  ;;  %v690_v59 = vld [vmem:[%s2076_s23 + $0x80] sm:$0xff] }
  0xbc   : > { %1285 = vmatpush1.bf16.msra.mxu0 %v1284_v30  ;;  %v1206_v49 = vpack.c.bf16 %v477_v41, %v473_v40  ;;  %v691_v51 = vld [vmem:[%s2076_s23 + $0x88] sm:$0xff]  ;;  %v484_v62 = vld [vmem:[%s2063_s9 + $0x3e0] sm:$0xff]  ;;  %v1296_v3 = vpack.c.bf16 %v692_v60, %v690_v59  ;;  %v374_v22 = vld [vmem:[%s2063_s9 + $0x70] sm:$0xff] }
  0xbd   : > { %1287 = vmatprep.subr.bf16.mxu0 %v1286_v33  ;;  %v481_v53 = vld [vmem:[%s2063_s9 + $0x3c8] sm:$0xff]  ;;  %v698_v19 = vld [vmem:[%s2076_s23 + $0xc0] sm:$0xff]  ;;  %v705_v25 = vld [vmem:[%s2076_s23 + $0xf8] sm:$0xff]  ;;  %v1220_v29 = vpack.c.bf16 %v374_v22, %v370_v18 }
  0xbe   : > { %1185 = vmatpush1.bf16.msra.mxu1 %v1184_v57  ;;  %v485_v54 = vld [vmem:[%s2063_s9 + $0x3e8] sm:$0xff]  ;;  %v480_v57 = vld [vmem:[%s2063_s9 + $0x3c0] sm:$0xff]  ;;  %v379_v26 = vld [vmem:[%s2063_s9 + $0x98] sm:$0xff]  ;;  %v1304_v28 = vpack.c.bf16 %v700_v20, %v698_v19 }
  0xbf   : > { %1187 = vmatprep.subr.bf16.mxu1 %v1186_v58  ;;  %v1294_v58 = vpack.c.bf16 %v693_v52, %v691_v51  ;;  %v1210_v61 = vpack.c.bf16 %v485_v54, %v481_v53  ;;  %v1212_v4 = vpack.c.bf16 %v484_v62, %v480_v57  ;;  %v699_v13 = vld [vmem:[%s2076_s23 + $0xc8] sm:$0xff]  ;;  %v383_v27 = vld [vmem:[%s2063_s9 + $0xb8] sm:$0xff]  ;;  %v378_v30 = vld [vmem:[%s2063_s9 + $0x90] sm:$0xff] }
  0xc0   : > { %1289 = vmatpush1.bf16.msra.mxu0 %v1288_v43  ;;  %v1302_v23 = vpack.c.bf16 %v701_v14, %v699_v13  ;;  %v703_v24 = vld [vmem:[%s2076_s23 + $0xe8] sm:$0xff]  ;;  %v702_v32 = vld [vmem:[%s2076_s23 + $0xe0] sm:$0xff]  ;;  %v704_v33 = vld [vmem:[%s2076_s23 + $0xf0] sm:$0xff]  ;;  %v1222_v34 = vpack.c.bf16 %v383_v27, %v379_v26 }
  0xc1   : > { %1291 = vmatprep.subr.bf16.mxu0 %v1290_v46  ;;  %v382_v35 = vld [vmem:[%s2063_s9 + $0xb0] sm:$0xff]  ;;  %v709_v37 = vld [vmem:[%s2076_s23 + $0x118] sm:$0xff]  ;;  %v711_v48 = vld [vmem:[%s2076_s23 + $0x128] sm:$0xff] }
  0xc2   : > { %1189 = vmatpush1.bf16.msra.mxu1 %v1188_v63  ;;  %v695_v63 = vld [vmem:[%s2076_s23 + $0xa8] sm:$0xff]  ;;  %v387_v38 = vld [vmem:[%s2063_s9 + $0xd8] sm:$0xff]  ;;  %v1224_v40 = vpack.c.bf16 %v382_v35, %v378_v30  ;;  %v386_v41 = vld [vmem:[%s2063_s9 + $0xd0] sm:$0xff] }
  0xc3   : > { %1191 = vmatprep.subr.bf16.mxu1 %v1190_v0  ;;  %v697_v0 = vld [vmem:[%s2076_s23 + $0xb8] sm:$0xff]  ;;  %v708_v45 = vld [vmem:[%s2076_s23 + $0x110] sm:$0xff]  ;;  %v715_v60 = vld [vmem:[%s2076_s23 + $0x148] sm:$0xff] }
  0xc4   : > { %1293 = vmatpush1.bf16.msra.mxu0 %v1292_v55  ;;  %v391_v39 = vld [vmem:[%s2063_s9 + $0xf8] sm:$0xff]  ;;  %v390_v47 = vld [vmem:[%s2063_s9 + $0xf0] sm:$0xff] }
  0xc5   : > { %1295 = vmatprep.subr.bf16.mxu0 %v1294_v58  ;;  %v1226_v46 = vpack.c.bf16 %v391_v39, %v387_v38  ;;  %v395_v50 = vld [vmem:[%s2063_s9 + $0x118] sm:$0xff]  ;;  %v1228_v53 = vpack.c.bf16 %v390_v47, %v386_v41  ;;  %v394_v54 = vld [vmem:[%s2063_s9 + $0x110] sm:$0xff] }
  0xc6   : > { %1193 = vmatpush1.bf16.msra.mxu1 %v1192_v5  ;;  %v1298_v5 = vpack.c.bf16 %v697_v0, %v695_v63  ;;  %v399_v51 = vld [vmem:[%s2063_s9 + $0x138] sm:$0xff]  ;;  %v712_v57 = vld [vmem:[%s2076_s23 + $0x130] sm:$0xff] }
  0xc7   : > { %1195 = vmatprep.subr.bf16.mxu1 %v1194_v6  ;;  %v694_v6 = vld [vmem:[%s2076_s23 + $0xa0] sm:$0xff]  ;;  %v1230_v58 = vpack.c.bf16 %v399_v51, %v395_v50  ;;  %v398_v59 = vld [vmem:[%s2063_s9 + $0x130] sm:$0xff]  ;;  %v403_v62 = vld [vmem:[%s2063_s9 + $0x158] sm:$0xff] }
  0xc8   : > { %1297 = vmatpush1.bf16.msra.mxu0 %v1296_v3  ;;  %v1300_v16 = vpack.c.bf16 %v696_v7, %v694_v6  ;;  %v407_v63 = vld [vmem:[%s2063_s9 + $0x178] sm:$0xff]  ;;  %v1232_v1 = vpack.c.bf16 %v398_v59, %v394_v54  ;;  %v714_v3 = vld [vmem:[%s2076_s23 + $0x140] sm:$0xff]  ;;  %v402_v6 = vld [vmem:[%s2063_s9 + $0x150] sm:$0xff] }
  0xc9   : > { %1299 = vmatprep.subr.bf16.mxu0 %v1298_v5  ;;  %v1234_v5 = vpack.c.bf16 %v407_v63, %v403_v62  ;;  %v406_v7 = vld [vmem:[%s2063_s9 + $0x170] sm:$0xff]  ;;  %v415_v9 = vld [vmem:[%s2063_s9 + $0x1b8] sm:$0xff] }
  0xca   : > { %1197 = vmatpush1.bf16.msra.mxu1 %v1196_v15  ;;  %v2182_v15 = vld [vmem:[%s2055_s17] sm:$0xff]  ;;  %v427_v22 = vld [vmem:[%s2063_s9 + $0x218] sm:$0xff] }
  0xcb   : > { %1199 = vmatprep.subr.bf16.mxu1 %v1198_v21  ;;  %v1218_v21 = vpack.c.bf16 %v375_v12, %v371_v11  ;;  %v1236_v11 = vpack.c.bf16 %v406_v7, %v402_v6  ;;  %v410_v13 = vld [vmem:[%s2063_s9 + $0x190] sm:$0xff]  ;;  %v447_v35 = vld [vmem:[%s2063_s9 + $0x2b8] sm:$0xff]  ;;  %v719_v7 = vld [vmem:[%s2076_s23 + $0x168] sm:$0xff] }
  0xcc   : > { %1301 = vmatpush1.bf16.msra.mxu0 %v1300_v16  ;;  %v414_v14 = vld [vmem:[%s2063_s9 + $0x1b0] sm:$0xff]  ;;  %v419_v16 = vld [vmem:[%s2063_s9 + $0x1d8] sm:$0xff] }
  0xcd   : > { %1303 = vmatprep.subr.bf16.mxu0 %v1302_v23  ;;  %v1240_v18 = vpack.c.bf16 %v414_v14, %v410_v13  ;;  %v418_v20 = vld [vmem:[%s2063_s9 + $0x1d0] sm:$0xff]  ;;  %v431_v23 = vld [vmem:[%s2063_s9 + $0x238] sm:$0xff]  ;;  %v723_v13 = vld [vmem:[%s2076_s23 + $0x188] sm:$0xff] }
  0xce   : > { %1201 = vmatpush1.bf16.msra.mxu1 %v1200_v31  ;;  %v1306_v31 = vpack.c.bf16 %v705_v25, %v703_v24  ;;  %v1246_v25 = vpack.c.bf16 %v431_v23, %v427_v22  ;;  %v426_v26 = vld [vmem:[%s2063_s9 + $0x210] sm:$0xff]  ;;  %v463_v47 = vld [vmem:[%s2063_s9 + $0x338] sm:$0xff]  ;;  %v726_v22 = vld [vmem:[%s2076_s23 + $0x1a0] sm:$0xff] }
  0xcf   : > { %1203 = vmatprep.subr.bf16.mxu1 %v1202_v36  ;;  %v707_v36 = vld [vmem:[%s2076_s23 + $0x108] sm:$0xff]  ;;  %v430_v27 = vld [vmem:[%s2063_s9 + $0x230] sm:$0xff]  ;;  %v479_v59 = vld [vmem:[%s2063_s9 + $0x3b8] sm:$0xff] }
  0xd0   : > { %1305 = vmatpush1.bf16.msra.mxu0 %v1304_v28  ;;  %v1310_v43 = vpack.c.bf16 %v709_v37, %v707_v36  ;;  %v435_v28 = vld [vmem:[%s2063_s9 + $0x258] sm:$0xff]  ;;  %v1248_v30 = vpack.c.bf16 %v430_v27, %v426_v26  ;;  %v442_v38 = vld [vmem:[%s2063_s9 + $0x290] sm:$0xff] }
  0xd1   : > { %1307 = vmatprep.subr.bf16.mxu0 %v1306_v31  ;;  %v446_v39 = vld [vmem:[%s2063_s9 + $0x2b0] sm:$0xff]  ;;  %v725_v14 = vld [vmem:[%s2076_s23 + $0x198] sm:$0xff] }
  0xd2   : > { %1205 = vmatpush1.bf16.msra.mxu1 %v1204_v44  ;;  %v706_v44 = vld [vmem:[%s2076_s23 + $0x100] sm:$0xff]  ;;  %v1256_v41 = vpack.c.bf16 %v446_v39, %v442_v38  ;;  %v458_v50 = vld [vmem:[%s2063_s9 + $0x310] sm:$0xff]  ;;  %v733_v26 = vld [vmem:[%s2076_s23 + $0x1d8] sm:$0xff] }
  0xd3   : > { %1207 = vmatprep.subr.bf16.mxu1 %v1206_v49  ;;  %v713_v49 = vld [vmem:[%s2076_s23 + $0x138] sm:$0xff]  ;;  %v1312_v52 = vpack.c.bf16 %v708_v45, %v706_v44  ;;  %v450_v44 = vld [vmem:[%s2063_s9 + $0x2d0] sm:$0xff] }
  0xd4   : > { %v1314_v55 = vpack.c.bf16 %v713_v49, %v711_v48  ;;  %v454_v45 = vld [vmem:[%s2063_s9 + $0x2f0] sm:$0xff]  ;;  %v741_v38 = vld [vmem:[%s2076_s23 + $0x218] sm:$0xff] }
  0xd5   : > { %v1260_v48 = vpack.c.bf16 %v454_v45, %v450_v44  ;;  %v462_v51 = vld [vmem:[%s2063_s9 + $0x330] sm:$0xff] }
  0xd6   : > { %1209 = vmatpush1.bf16.msra.mxu1 %v1208_v56  ;;  %v710_v56 = vld [vmem:[%s2076_s23 + $0x120] sm:$0xff]  ;;  %v1264_v54 = vpack.c.bf16 %v462_v51, %v458_v50  ;;  %v474_v62 = vld [vmem:[%s2063_s9 + $0x390] sm:$0xff] }
  0xd7   : > { %1211 = vmatprep.subr.bf16.mxu1 %v1210_v61  ;;  %v717_v61 = vld [vmem:[%s2076_s23 + $0x158] sm:$0xff]  ;;  %v1316_v0 = vpack.c.bf16 %v712_v57, %v710_v56  ;;  %v466_v56 = vld [vmem:[%s2063_s9 + $0x350] sm:$0xff] }
  0xd8   : > { %v1318_v2 = vpack.c.bf16 %v717_v61, %v715_v60  ;;  %v470_v57 = vld [vmem:[%s2063_s9 + $0x370] sm:$0xff] }
  0xd9   : > { %v1268_v60 = vpack.c.bf16 %v470_v57, %v466_v56  ;;  %v478_v63 = vld [vmem:[%s2063_s9 + $0x3b0] sm:$0xff]  ;;  %v738_v56 = vld [vmem:[%s2076_s23 + $0x200] sm:$0xff] }
  0xda   : > { %1213 = vmatpush1.bf16.msra.mxu1 %v1212_v4  ;;  %v716_v4 = vld [vmem:[%s2076_s23 + $0x150] sm:$0xff] }
  0xdb   : > { %1215 = vmatprep.subr.bf16.mxu1 %v1214_v8  ;;  %v411_v8 = vld [vmem:[%s2063_s9 + $0x198] sm:$0xff]  ;;  %v1320_v10 = vpack.c.bf16 %v716_v4, %v714_v3  ;;  %v482_v4 = vld [vmem:[%s2063_s9 + $0x3d0] sm:$0xff] }
  0xdc   : > { %v1238_v12 = vpack.c.bf16 %v415_v9, %v411_v8  ;;  %v721_v8 = vld [vmem:[%s2076_s23 + $0x178] sm:$0xff]  ;;  %v728_v23 = vld [vmem:[%s2076_s23 + $0x1b0] sm:$0xff] }
  0xdd   : > { %575 = vmatmul.mubr.f32.vlgmr.msra.gmra.mrb[0].mxu1 %v2182_v15  ;;  %v1322_v9 = vpack.c.bf16 %v721_v8, %v719_v7  ;;  %v740_v57 = vld [vmem:[%s2076_s23 + $0x210] sm:$0xff] }
  0xde   : > { %1217 = vmatpush1.bf16.msra.mxu1 %v1216_v17  ;;  %645 = vmatprep.mubr.f32.mxu1 %v2110_v42  ;;  %v1308_v42 = vpack.c.bf16 %v704_v33, %v702_v32  ;;  %v423_v17 = vld [vmem:[%s2063_s9 + $0x1f8] sm:$0xff]  ;;  %v434_v32 = vld [vmem:[%s2063_s9 + $0x250] sm:$0xff] }
  0xdf   : > { %1219 = vmatprep.subr.bf16.mxu1 %v1218_v21  ;;  %v1242_v19 = vpack.c.bf16 %v423_v17, %v419_v16  ;;  %v422_v21 = vld [vmem:[%s2063_s9 + $0x1f0] sm:$0xff]  ;;  %v1326_v16 = vpack.c.bf16 %v725_v14, %v723_v13  ;;  %v722_v17 = vld [vmem:[%s2076_s23 + $0x180] sm:$0xff] }
  0xe0   : > { %1309 = vmatpush1.bf16.msra.mxu0 %v1308_v42  ;;  %v1244_v24 = vpack.c.bf16 %v422_v21, %v418_v20  ;;  %v438_v33 = vld [vmem:[%s2063_s9 + $0x270] sm:$0xff]  ;;  %v451_v42 = vld [vmem:[%s2063_s9 + $0x2d8] sm:$0xff] }
  0xe1   : > { %1311 = vmatprep.subr.bf16.mxu0 %v1310_v43  ;;  %v1252_v36 = vpack.c.bf16 %v438_v33, %v434_v32  ;;  %v729_v20 = vld [vmem:[%s2076_s23 + $0x1b8] sm:$0xff] }
  0xe2   : > { %1221 = vmatpush1.bf16.msra.mxu1 %v1220_v29  ;;  %v439_v29 = vld [vmem:[%s2063_s9 + $0x278] sm:$0xff] }
  0xe3   : > { %1223 = vmatprep.subr.bf16.mxu1 %v1222_v34  ;;  %v1250_v31 = vpack.c.bf16 %v439_v29, %v435_v28  ;;  %v443_v34 = vld [vmem:[%s2063_s9 + $0x298] sm:$0xff]  ;;  %v730_v28 = vld [vmem:[%s2076_s23 + $0x1c0] sm:$0xff]  ;;  %v732_v29 = vld [vmem:[%s2076_s23 + $0x1d0] sm:$0xff] }
  0xe4   : > { %1313 = vmatpush1.bf16.msra.mxu0 %v1312_v52  ;;  %v1254_v37 = vpack.c.bf16 %v447_v35, %v443_v34  ;;  %v467_v52 = vld [vmem:[%s2063_s9 + $0x358] sm:$0xff]  ;;  %v734_v34 = vld [vmem:[%s2076_s23 + $0x1e0] sm:$0xff]  ;;  %v736_v35 = vld [vmem:[%s2076_s23 + $0x1f0] sm:$0xff] }
  0xe5   : > { %1315 = vmatprep.subr.bf16.mxu0 %v1314_v55  ;;  %v737_v32 = vld [vmem:[%s2076_s23 + $0x1f8] sm:$0xff] }
  0xe6   : > { %1225 = vmatpush1.bf16.msra.mxu1 %v1224_v40  ;;  %v455_v40 = vld [vmem:[%s2063_s9 + $0x2f8] sm:$0xff] }
  0xe7   : > { %1227 = vmatprep.subr.bf16.mxu1 %v1226_v46  ;;  %v1258_v43 = vpack.c.bf16 %v455_v40, %v451_v42  ;;  %v459_v46 = vld [vmem:[%s2063_s9 + $0x318] sm:$0xff]  ;;  %v490_v42 = vlaneseq }
  0xe8   : > { %1317 = vmatpush1.bf16.msra.mxu0 %v1316_v0  ;;  %v1262_v49 = vpack.c.bf16 %v463_v47, %v459_v46  ;;  %v483_v0 = vld [vmem:[%s2063_s9 + $0x3d8] sm:$0xff] }
  0xe9   : > { %1319 = vmatprep.subr.bf16.mxu0 %v1318_v2  ;;  %v1272_v2 = vpack.c.bf16 %v478_v63, %v474_v62  ;;  %v2285_v40 = vshrl.u32 %v490_v42, 7  ;;  %v768_v42 = vld [vmem:[%s2076_s23 + $0x2f0] sm:$0xff] }
  0xea   : > { %1229 = vmatpush1.bf16.msra.mxu1 %v1228_v53  ;;  %v471_v53 = vld [vmem:[%s2063_s9 + $0x378] sm:$0xff] }
  0xeb   : > { %1231 = vmatprep.subr.bf16.mxu1 %v1230_v58  ;;  %v1266_v55 = vpack.c.bf16 %v471_v53, %v467_v52  ;;  %v475_v58 = vld [vmem:[%s2063_s9 + $0x398] sm:$0xff]  ;;  %v496_v44 = vsub.s32 1, %v2285_v40 }
  0xec   : > { %1321 = vmatpush1.bf16.msra.mxu0 %v1320_v10  ;;  %v1270_v61 = vpack.c.bf16 %v479_v59, %v475_v58  ;;  %v718_v10 = vld [vmem:[%s2076_s23 + $0x160] sm:$0xff] }
  0xed   : > { %1323 = vmatprep.subr.bf16.mxu0 %v1322_v9  ;;  %v746_v9 = vld [vmem:[%s2076_s23 + $0x240] sm:$0xff] }
  0xee   : > { %1233 = vmatpush1.bf16.msra.mxu1 %v1232_v1  ;;  %v487_v1 = vld [vmem:[%s2063_s9 + $0x3f8] sm:$0xff] }
  0xef   : > { %1235 = vmatprep.subr.bf16.mxu1 %v1234_v5  ;;  %v1274_v3 = vpack.c.bf16 %v487_v1, %v483_v0  ;;  %v486_v5 = vld [vmem:[%s2063_s9 + $0x3f0] sm:$0xff]  ;;  %v1344_v0 = vpack.c.bf16 %v740_v57, %v738_v56  ;;  %v779_v57 = vld [vmem:[%s2076_s23 + $0x348] sm:$0xff] }
  0xf0   : > { %v1276_v6 = vpack.c.bf16 %v486_v5, %v482_v4  ;;  %v744_v4 = vld [vmem:[%s2076_s23 + $0x230] sm:$0xff]  ;;  %v747_v5 = vld [vmem:[%s2076_s23 + $0x248] sm:$0xff] }
  0xf1   : > { %v776_v56 = vld [vmem:[%s2076_s23 + $0x330] sm:$0xff] }
  0xf2   : > { %1237 = vmatpush1.bf16.msra.mxu1 %v1236_v11  ;;  %v720_v11 = vld [vmem:[%s2076_s23 + $0x170] sm:$0xff] }
  0xf3   : > { %1239 = vmatprep.subr.bf16.mxu1 %v1238_v12  ;;  %v1324_v12 = vpack.c.bf16 %v720_v11, %v718_v10  ;;  %v748_v10 = vld [vmem:[%s2076_s23 + $0x250] sm:$0xff]  ;;  %v751_v11 = vld [vmem:[%s2076_s23 + $0x268] sm:$0xff] }
  0xf4   : > { %v1352_v13 = vpack.c.bf16 %v748_v10, %v746_v9  ;;  %v789_v9 = vld [vmem:[%s2076_s23 + $0x398] sm:$0xff] }
  0xf5   : > { %1325 = vmatpush1.bf16.msra.mxu0 %v1324_v12  ;;  %v753_v12 = vld [vmem:[%s2076_s23 + $0x278] sm:$0xff] }
  0xf6   : > { %1241 = vmatpush1.bf16.msra.mxu1 %v1240_v18  ;;  %1327 = vmatprep.subr.bf16.mxu0 %v1326_v16  ;;  %v1354_v14 = vpack.c.bf16 %v753_v12, %v751_v11  ;;  %v750_v16 = vld [vmem:[%s2076_s23 + $0x260] sm:$0xff] }
  0xf7   : > { %1243 = vmatprep.subr.bf16.mxu1 %v1242_v19  ;;  %v727_v19 = vld [vmem:[%s2076_s23 + $0x1a8] sm:$0xff] }
  0xf8   : > { %v1330_v21 = vpack.c.bf16 %v729_v20, %v727_v19 }
  0xfa   : > { %1245 = vmatpush1.bf16.msra.mxu1 %v1244_v24  ;;  %v1332_v24 = vpack.c.bf16 %v728_v23, %v726_v22  ;;  %v756_v22 = vld [vmem:[%s2076_s23 + $0x290] sm:$0xff]  ;;  %v759_v23 = vld [vmem:[%s2076_s23 + $0x2a8] sm:$0xff] }
  0xfb   : > { %1247 = vmatprep.subr.bf16.mxu1 %v1246_v25  ;;  %v731_v25 = vld [vmem:[%s2076_s23 + $0x1c8] sm:$0xff] }
  0xfc   : > { %v1334_v27 = vpack.c.bf16 %v733_v26, %v731_v25 }
  0xfe   : > { %1249 = vmatpush1.bf16.msra.mxu1 %v1248_v30  ;;  %v1336_v30 = vpack.c.bf16 %v732_v29, %v730_v28  ;;  %v760_v28 = vld [vmem:[%s2076_s23 + $0x2b0] sm:$0xff]  ;;  %v763_v29 = vld [vmem:[%s2076_s23 + $0x2c8] sm:$0xff] }
  0xff   : > { %1251 = vmatprep.subr.bf16.mxu1 %v1250_v31  ;;  %v735_v31 = vld [vmem:[%s2076_s23 + $0x1e8] sm:$0xff] }
 0x100   : > { %v1338_v33 = vpack.c.bf16 %v737_v32, %v735_v31 }
 0x102   : > { %1253 = vmatpush1.bf16.msra.mxu1 %v1252_v36  ;;  %v1340_v36 = vpack.c.bf16 %v736_v35, %v734_v34  ;;  %v764_v34 = vld [vmem:[%s2076_s23 + $0x2d0] sm:$0xff]  ;;  %v767_v35 = vld [vmem:[%s2076_s23 + $0x2e8] sm:$0xff] }
 0x103   : > { %1255 = vmatprep.subr.bf16.mxu1 %v1254_v37  ;;  %v739_v37 = vld [vmem:[%s2076_s23 + $0x208] sm:$0xff] }
 0x104   : > { %v1342_v39 = vpack.c.bf16 %v741_v38, %v739_v37 }
 0x106   : > { %1257 = vmatpush1.bf16.msra.mxu1 %v1256_v41  ;;  %v492_v41 = vsub.s32 0, %v2285_v40 }
 0x107   : > { %1259 = vmatprep.subr.bf16.mxu1 %v1258_v43  ;;  %v2293_v43 = vld [vmem:[%s349_s30] sm:$0xf] }
 0x108   : > { %v493_v45 = vrot.slane %v2293_v43, %v492_v41  ;;  %v497_v46 = vrot.slane %v2293_v43, %v496_v44 }
 0x10a   : > { %1261 = vmatpush1.bf16.msra.mxu1 %v1260_v48 }
 0x10b   : > { %1263 = vmatprep.subr.bf16.mxu1 %v1262_v49 }
 0x10e   : > { %1265 = vmatpush1.bf16.msra.mxu1 %v1264_v54 }
 0x10f   : > { %1267 = vmatprep.subr.bf16.mxu1 %v1266_v55 }
 0x112   : > { %1269 = vmatpush1.bf16.msra.mxu1 %v1268_v60  ;;  %v743_v60 = vld [vmem:[%s2076_s23 + $0x228] sm:$0xff] }
 0x113   : > { %1271 = vmatprep.subr.bf16.mxu1 %v1270_v61  ;;  %v745_v61 = vld [vmem:[%s2076_s23 + $0x238] sm:$0xff] }
 0x116   : > { %1273 = vmatpush1.bf16.msra.mxu1 %v1272_v2  ;;  %v1346_v2 = vpack.c.bf16 %v745_v61, %v743_v60  ;;  %v778_v61 = vld [vmem:[%s2076_s23 + $0x340] sm:$0xff] }
 0x117   : > { %1275 = vmatprep.subr.bf16.mxu1 %v1274_v3  ;;  %v742_v3 = vld [vmem:[%s2076_s23 + $0x220] sm:$0xff] }
 0x118   : > { %v1348_v7 = vpack.c.bf16 %v744_v4, %v742_v3 }
 0x11a   : > { %1277 = vmatpush1.bf16.msra.mxu1 %v1276_v6  ;;  %v749_v6 = vld [vmem:[%s2076_s23 + $0x258] sm:$0xff] }
 0x11b   : > { %v1350_v8 = vpack.c.bf16 %v749_v6, %v747_v5  ;;  %v782_v5 = vld [vmem:[%s2076_s23 + $0x360] sm:$0xff]  ;;  %v784_v6 = vld [vmem:[%s2076_s23 + $0x370] sm:$0xff] }
 0x11c   : > { %v1388_v11 = vpack.c.bf16 %v784_v6, %v782_v5 }
 0x11d   : > { %646 = vmatmul.mubr.f32.vlgmr.msra.gmra.mrb[2].mxu1 %v2182_v15  ;;  %v724_v15 = vld [vmem:[%s2076_s23 + $0x190] sm:$0xff] }
 0x11e   : > { %v1328_v18 = vpack.c.bf16 %v724_v15, %v722_v17  ;;  %v752_v17 = vld [vmem:[%s2076_s23 + $0x270] sm:$0xff]  ;;  %v755_v15 = vld [vmem:[%s2076_s23 + $0x288] sm:$0xff] }
 0x11f   : > { %v1356_v19 = vpack.c.bf16 %v752_v17, %v750_v16  ;;  %v788_v16 = vld [vmem:[%s2076_s23 + $0x390] sm:$0xff] }
 0x120   : > { %1329 = vmatpush1.bf16.msra.mxu0 %v1328_v18  ;;  %v757_v18 = vld [vmem:[%s2076_s23 + $0x298] sm:$0xff] }
 0x121   : > { %1331 = vmatprep.subr.bf16.mxu0 %v1330_v21  ;;  %v1358_v20 = vpack.c.bf16 %v757_v18, %v755_v15  ;;  %v754_v21 = vld [vmem:[%s2076_s23 + $0x280] sm:$0xff]  ;;  %v791_v18 = vld [vmem:[%s2076_s23 + $0x3a8] sm:$0xff] }
 0x122   : > { %v1360_v25 = vpack.c.bf16 %v756_v22, %v754_v21 }
 0x124   : > { %1333 = vmatpush1.bf16.msra.mxu0 %v1332_v24  ;;  %v761_v24 = vld [vmem:[%s2076_s23 + $0x2b8] sm:$0xff] }
 0x125   : > { %1335 = vmatprep.subr.bf16.mxu0 %v1334_v27  ;;  %v1362_v26 = vpack.c.bf16 %v761_v24, %v759_v23  ;;  %v758_v27 = vld [vmem:[%s2076_s23 + $0x2a0] sm:$0xff] }
 0x126   : > { %v1364_v31 = vpack.c.bf16 %v760_v28, %v758_v27  ;;  %v790_v24 = vld [vmem:[%s2076_s23 + $0x3a0] sm:$0xff]  ;;  %v797_v27 = vld [vmem:[%s2076_s23 + $0x3d8] sm:$0xff] }
 0x128   : > { %1337 = vmatpush1.bf16.msra.mxu0 %v1336_v30  ;;  %v765_v30 = vld [vmem:[%s2076_s23 + $0x2d8] sm:$0xff] }
 0x129   : > { %1339 = vmatprep.subr.bf16.mxu0 %v1338_v33  ;;  %v1366_v32 = vpack.c.bf16 %v765_v30, %v763_v29  ;;  %v762_v33 = vld [vmem:[%s2076_s23 + $0x2c0] sm:$0xff] }
 0x12a   : > { %v1368_v37 = vpack.c.bf16 %v764_v34, %v762_v33  ;;  %v794_v30 = vld [vmem:[%s2076_s23 + $0x3c0] sm:$0xff]  ;;  %v801_v33 = vld [vmem:[%s2076_s23 + $0x3f8] sm:$0xff] }
 0x12c   : > { %1341 = vmatpush1.bf16.msra.mxu0 %v1340_v36  ;;  %v769_v36 = vld [vmem:[%s2076_s23 + $0x2f8] sm:$0xff] }
 0x12d   : > { %1343 = vmatprep.subr.bf16.mxu0 %v1342_v39  ;;  %v1370_v38 = vpack.c.bf16 %v769_v36, %v767_v35  ;;  %v766_v39 = vld [vmem:[%s2076_s23 + $0x2e0] sm:$0xff] }
 0x12e   : > { %v798_v36 = vld [vmem:[%s2076_s23 + $0x3e0] sm:$0xff] }
 0x1b0   : > { %v576_v47 = vpop.f32.mrb[0].mxu1 }
 0x1b1   : > { %v577_v48 = vadd.f32 %v576_v47, %v493_v45  ;;  %v578_v49 = vpop.f32.mrb[1].mxu1  ;;  %v771_v45 = vld [vmem:[%s2076_s23 + $0x308] sm:$0xff]  ;;  %v1372_v47 = vpack.c.bf16 %v768_v42, %v766_v39 }
 0x1b2   : > { %v579_v50 = vadd.f32 %v578_v49, %v497_v46  ;;  %v773_v46 = vld [vmem:[%s2076_s23 + $0x318] sm:$0xff]  ;;  %v770_v49 = vld [vmem:[%s2076_s23 + $0x300] sm:$0xff] }
 0x1b3   : > { %v656_v51 = vmul.f32 0.70710677, %v577_v48  ;;  %v652_v62 = vmul.f32 0.5, %v577_v48  ;;  %v1374_v48 = vpack.c.bf16 %v773_v46, %v771_v45 }
 0x1b4   : > { %v657_v52 = vmul.f32 0.70710677, %v579_v50  ;;  %v653_v58 = vmul.f32 0.5, %v579_v50  ;;  %v772_v50 = vld [vmem:[%s2076_s23 + $0x310] sm:$0xff] }
 0x1b5   : > { %1526 = verf.f32 %v656_v51  ;;  %v775_v51 = vld [vmem:[%s2076_s23 + $0x328] sm:$0xff] }
 0x1b6   : > { %1528 = verf.f32 %v657_v52  ;;  %v777_v52 = vld [vmem:[%s2076_s23 + $0x338] sm:$0xff] }
 0x1bf   : > { %v1527_v53 = vpop.eup %1526 }
 0x1c0   : > { %v1529_v54 = vpop.eup %1528  ;;  %v664_v55 = vadd.f32 1.0, %v1527_v53  ;;  %v1376_v53 = vpack.c.bf16 %v772_v50, %v770_v49 }
 0x1c1   : > { %v665_v59 = vadd.f32 1.0, %v1529_v54  ;;  %v1378_v54 = vpack.c.bf16 %v777_v52, %v775_v51  ;;  %v672_v51 = vld [vmem:[#allocation2] sm:$0xff]  ;;  %v673_v52 = vld [vmem:[#allocation2 + $0x8] sm:$0xff] }
 0x1c2   : > { %v668_v1 = vmul.f32 %v664_v55, %v652_v62  ;;  %v774_v55 = vld [vmem:[%s2076_s23 + $0x320] sm:$0xff]  ;;  %v780_v62 = vld [vmem:[%s2076_s23 + $0x350] sm:$0xff] }
 0x1c3   : > { %v669_v63 = vmul.f32 %v665_v59, %v653_v58  ;;  %v781_v58 = vld [vmem:[%s2076_s23 + $0x358] sm:$0xff]  ;;  %v1380_v59 = vpack.c.bf16 %v776_v56, %v774_v55  ;;  %v1384_v3 = vpack.c.bf16 %v780_v62, %v778_v61 }
 0x1c4   : > { %v1382_v60 = vpack.c.bf16 %v781_v58, %v779_v57  ;;  %v954_v58 = vld [vmem:[%s2485_s8] sm:$0x3] (!%p1139_p0) }
 0x1c5   : > { %866 = vmatprep.mubr.f32.mxu0 %v669_v63  ;;  %v500_v63 = vsub.s32 2, %v2285_v40  ;;  %v963_v61 = vrot.slane (!%p1139_p0), %v954_v58, %v496_v44 }
 0x1c6   : > { %867 = vmatmul.mubr.f32.vlgmr.msra.gmra.mrb[0].mxu0 %v668_v1  ;;  %v785_v1 = vld [vmem:[%s2076_s23 + $0x378] sm:$0xff] }
 0x1c7   : > { %1345 = vmatpush1.bf16.msra.mxu0 %v1344_v0  ;;  %v783_v0 = vld [vmem:[%s2076_s23 + $0x368] sm:$0xff] }
 0x1c8   : > { %1347 = vmatprep.subr.bf16.mxu0 %v1346_v2  ;;  %v504_v2 = vsub.s32 3, %v2285_v40  ;;  %v1386_v4 = vpack.c.bf16 %v785_v1, %v783_v0 }
 0x1ca   : > { %v505_v10 = vrot.slane %v2293_v43, %v504_v2 }
 0x1cb   : > { %1349 = vmatpush1.bf16.msra.mxu0 %v1348_v7  ;;  %v501_v7 = vrot.slane %v2293_v43, %v500_v63 }
 0x1cc   : > { %1351 = vmatprep.subr.bf16.mxu0 %v1350_v8  ;;  %v787_v8 = vld [vmem:[%s2076_s23 + $0x388] sm:$0xff] }
 0x1cf   : > { %1353 = vmatpush1.bf16.msra.mxu0 %v1352_v13  ;;  %v1390_v13 = vpack.c.bf16 %v789_v9, %v787_v8 }
 0x1d0   : > { %1355 = vmatprep.subr.bf16.mxu0 %v1354_v14  ;;  %v786_v14 = vld [vmem:[%s2076_s23 + $0x380] sm:$0xff] }
 0x1d1   : > { %v1392_v43 = vpack.c.bf16 %v788_v16, %v786_v14 }
 0x1d3   : > { %1357 = vmatpush1.bf16.msra.mxu0 %v1356_v19  ;;  %v793_v19 = vld [vmem:[%s2076_s23 + $0x3b8] sm:$0xff] }
 0x1d4   : > { %1359 = vmatprep.subr.bf16.mxu0 %v1358_v20  ;;  %v1394_v23 = vpack.c.bf16 %v793_v19, %v791_v18 }
 0x1d7   : > { %1361 = vmatpush1.bf16.msra.mxu0 %v1360_v25  ;;  %v792_v25 = vld [vmem:[%s2076_s23 + $0x3b0] sm:$0xff] }
 0x1d8   : > { %1363 = vmatprep.subr.bf16.mxu0 %v1362_v26  ;;  %v795_v26 = vld [vmem:[%s2076_s23 + $0x3c8] sm:$0xff]  ;;  %v1396_v28 = vpack.c.bf16 %v792_v25, %v790_v24 }
 0x1d9   : > { %v1398_v29 = vpack.c.bf16 %v797_v27, %v795_v26 }
 0x1db   : > { %1365 = vmatpush1.bf16.msra.mxu0 %v1364_v31  ;;  %v796_v31 = vld [vmem:[%s2076_s23 + $0x3d0] sm:$0xff] }
 0x1dc   : > { %1367 = vmatprep.subr.bf16.mxu0 %v1366_v32  ;;  %v799_v32 = vld [vmem:[%s2076_s23 + $0x3e8] sm:$0xff]  ;;  %v1400_v34 = vpack.c.bf16 %v796_v31, %v794_v30 }
 0x1dd   : > { %v1402_v35 = vpack.c.bf16 %v801_v33, %v799_v32 }
 0x1df   : > { %1369 = vmatpush1.bf16.msra.mxu0 %v1368_v37  ;;  %v800_v37 = vld [vmem:[%s2076_s23 + $0x3f0] sm:$0xff] }
 0x1e0   : > { %1371 = vmatprep.subr.bf16.mxu0 %v1370_v38  ;;  %v1404_v39 = vpack.c.bf16 %v800_v37, %v798_v36 }
 0x1e3   : > { %1373 = vmatpush1.bf16.msra.mxu0 %v1372_v47 }
 0x1e4   : > { %1375 = vmatprep.subr.bf16.mxu0 %v1374_v48 }
 0x1e7   : > { %1377 = vmatpush1.bf16.msra.mxu0 %v1376_v53 }
 0x1e8   : > { %1379 = vmatprep.subr.bf16.mxu0 %v1378_v54 }
 0x1eb   : > { %1381 = vmatpush1.bf16.msra.mxu0 %v1380_v59 }
 0x1ec   : > { %1383 = vmatprep.subr.bf16.mxu0 %v1382_v60  ;;  %v959_v60 = vrot.slane (!%p1139_p0), %v954_v58, %v492_v41 }
 0x1ef   : > { %1385 = vmatpush1.bf16.msra.mxu0 %v1384_v3 }
 0x1f0   : > { %v647_v12 = vpop.f32.mrb[2].mxu1  ;;  %1387 = vmatprep.subr.bf16.mxu0 %v1386_v4 }
 0x1f1   : > { %v648_v17 = vadd.f32 %v647_v12, %v501_v7  ;;  %v649_v15 = vpop.f32.mrb[3].mxu1 }
 0x1f2   : > { %v650_v20 = vadd.f32 %v649_v15, %v505_v10 }
 0x1f3   : > { %v658_v21 = vmul.f32 0.70710677, %v648_v17  ;;  %1389 = vmatpush1.bf16.msra.mxu0 %v1388_v11  ;;  %v654_v48 = vmul.f32 0.5, %v648_v17 }
 0x1f4   : > { %v659_v22 = vmul.f32 0.70710677, %v650_v20  ;;  %1391 = vmatprep.subr.bf16.mxu0 %v1390_v13  ;;  %v655_v46 = vmul.f32 0.5, %v650_v20 }
 0x1f5   : > { %1530 = verf.f32 %v658_v21 }
 0x1f6   : > { %1532 = verf.f32 %v659_v22 }
 0x1f7   : > { %1393 = vmatpush1.bf16.msra.mxu0 %v1392_v43 }
 0x1f8   : > { %1395 = vmatprep.subr.bf16.mxu0 %v1394_v23 }
 0x1fb   : > { %1397 = vmatpush1.bf16.msra.mxu0 %v1396_v28 }
 0x1fc   : > { %1399 = vmatprep.subr.bf16.mxu0 %v1398_v29 }
 0x1ff   : > { %v1531_v38 = vpop.eup %1530  ;;  %1401 = vmatpush1.bf16.msra.mxu0 %v1400_v34 }
 0x200   : > { %v1533_v42 = vpop.eup %1532  ;;  %v666_v45 = vadd.f32 1.0, %v1531_v38  ;;  %1403 = vmatprep.subr.bf16.mxu0 %v1402_v35 }
 0x201   : > { %v667_v47 = vadd.f32 1.0, %v1533_v42 }
 0x202   : > { %v670_v50 = vmul.f32 %v666_v45, %v654_v48 }
 0x203   : > { %1405 = vmatpush1.bf16.msra.mxu0 %v1404_v39  ;;  %v671_v49 = vmul.f32 %v667_v47, %v655_v46 }
 0x205   : > { %937 = vmatprep.mubr.f32.mxu0 %v671_v49 }
 0x206   : > { %938 = vmatmul.mubr.f32.vlgmr.msra.gmra.mrb[0].mxu0 %v670_v50 }
 0x2d7   : > { %951 = sbr.rel (%p1139_p0) target bundleno = 744 (0x2e8), region = 60 }
 0x2d9   : > { %v939_v53 = vpop.f32.mrb[0].mxu0 }
 0x2da   : > { %v944_v54 = vadd.f32 %v939_v53, %v672_v51  ;;  %v941_v55 = vpop.f32.mrb[1].mxu0 }
 0x2db   : > { %v945_v56 = vadd.f32 %v941_v55, %v673_v52 }
 0x2dc   : > { %946 = vst [vmem:[#allocation2] sm:$0xff] %v944_v54 }
 0x2dd   : > { %947 = vst [vmem:[#allocation2 + $0x8] sm:$0xff] %v945_v56 }
 0x2e3   : > { %v952_v57 = vld [vmem:[#allocation2] sm:$0xff] }
 0x2e4   : > { %v953_v59 = vld [vmem:[#allocation2 + $0x8] sm:$0xff]  ;;  %v966_v62 = vadd.f32 %v959_v60, %v952_v57 }
 0x2e5   : > { %v967_v63 = vadd.f32 %v963_v61, %v953_v59 }
 0x2e6   : > { %968 = vst [vmem:[%s2078_s18] sm:$0xff] %v966_v62 }
 0x2e7   : > { %969 = vst [vmem:[%s2078_s18 + $0x8] sm:$0xff] %v967_v63 }
 0x2e8 PF: > { %s2486_s24 = sld [smem:[#allocation14_spill]]  ;;  %s2487_s10 = sld [smem:[#allocation23_spill]] }
 0x2e9   : > { %s985_s9 = sshll.u32 %s2078_s18, 4  ;;  %s971_s1 = scalar_lea.sflag [#allocation5], %s2051_s13  ;;  %s986_s9 = int_to_ptr.vmem [resolvable:$true] %s985_s9 }
 0x2ea   : > { %s1624_s7 = scalar_lea.vmem %s986_s9, 256  ;;  %p2488_p13 = scmp.ne.s32.totalorder %s2474_s5, 0 }
 0x2eb   : > { %p1625_p3 = scmp.ne.s32.totalorder %s986_s9, %s1624_s7  ;;  %s1761_s25 = smov [#allocation9]  }
 0x2ec   : > { %s1628_s11 = sshll.u32 %s1761_s25, 4  ;;  %s1629_s11 = int_to_ptr.vmem [resolvable:$false] %s1628_s11 }
 0x2ed   : > { %p1626_p9 = pnand %p1625_p3, %p2488_p13  ;;  %s1630_s30 = scalar_lea.vmem %s1629_s11, 512 }
 0x2ee   : > { %s1149_s17 = sshll.u32 %s2486_s24, 8  ;;  %p1631_p11 = scmp.lt.s32.totalorder %s986_s9, %s1629_s11 }
 0x2ef   : > { %s2382_s4 = scalar_lea.hbm %s2487_s10, %s1149_s17  ;;  %p1627_p12 = pneg %p1626_p9 }
 0x2f0   : > { %p1632_p2 = scmp.lt.s32.totalorder %s1630_s30, %s1624_s7 }
 0x2f2   : > { %p1633_p1 = por %p1632_p2, %p1631_p11 }
 0x2f4   : > { %p1634_p5 = pnand %p1633_p1, %p1627_p12 }
 0x2f6   : > { %1637 = shalt.err (!%p1634_p5)
}
 0x2f7   : > { %s1638_s13 = scalar_lea.hbm %s2382_s4, 256  ;;  %s1642_s29 = scalar_lea.hbm %s2487_s10, 512 }
 0x2f8   : > { %p1639_p7 = scmp.ne.s32.totalorder %s2382_s4, %s1638_s13  ;;  %p1643_p10 = scmp.lt.u32.totalorder %s2382_s4, %s2487_s10 }
 0x2f9   : > { %p1644_p6 = scmp.lt.u32.totalorder %s1642_s29, %s1638_s13  ;;  %p1646_p3 = scmp.lt.u32.totalorder %s1638_s13, %s2382_s4 }
 0x2fa   : > { %p1640_p8 = pnand %p1639_p7, %p2488_p13 }
 0x2fb   : > { %p1645_p0 = por %p1644_p6, %p1643_p10 }
 0x2fc   : > { %p1641_p4 = pneg %p1640_p8 }
 0x2fd   : > { %p1647_p9 = por %p1646_p3, %p1645_p0 }
 0x2ff   : > { %p1648_p12 = pnand %p1647_p9, %p1641_p4 }
 0x301   : > { %1651 = shalt.err (!%p1648_p12)
}
 0x302   : > { %1414 = dma.vmem_to_hbm [thread:$0]  (%p2488_p13), %s986_s9, 256, %s2382_s4, %s971_s1  }
 0x303 PF: > { %p1431_p11 = scmp.ge.s32.totalorder %s1750_s28, 2  ;;  %s997_s16 = sand.u32 1, %s1722_s21  }
 0x304   : > { %p2489_p2 = scmp.ne.s32.totalorder %s2475_s6, 0  ;;  %s998_s27 = scalar_lea.sflag [#allocation5], %s997_s16 }
 0x306   : > { %p1427_p1 = pnand %p1431_p11, %p2489_p2 }
 0x308   : > { %1705 = dma.done.wait (!%p1427_p1), %s998_s27, 256  }
 0x309   : > { %1707 = vsyncadd (!%p1427_p1), %s998_s27, 4294967040  ;;  %s24_s28 = sadd.s32 1, %s1750_s28   ;;  %s2490_s8 = sld [smem:[#allocation18_spill]] }
 0x30a   : > { %p21_p5 = scmp.ge.s32.totalorder %s24_s28, 6   ;;  %s2491_s5 = sld [smem:[#allocation13_spill]] }
 0x30b   : > { %s2492_s23 = sld [smem:[#allocation19_spill]]  ;;  %s2493_s25 = sld [smem:[#allocation15_spill]] }
 0x30c   : > { %s2494_s17 = sld [smem:[#allocation16_spill]]  ;;  %s2495_s27 = sld [smem:[#allocation17_spill]] }
 0x30d   : > { %s2496_s18 = smov %s1714_s19  ;;  %s2497_s19 = smov %s1718_s20 }
 0x30e   : > { %s2499_s21 = smov %s1726_s22  ;;  %s2501_s24 = smov %s1742_s26 }
 0x30f   : > { %s2498_s20 = smov %s2490_s8  ;;  %23 = sbr.rel (!%p21_p5) target bundleno = 16 (0x10), region = 120 }
 0x310   : > { %s2500_s22 = smov %s2491_s5 }
 0x312   : > { %s2502_s26 = smov %s2494_s17 }
 0x316   :  { %1003 = vsyncpa [#allocation4], 1 }
 0x317   :  { %1005 = vsyncpa [#allocation4 + $0x1], 1 }
 0x318   :  { %1006 = vsyncpa [#allocation7], 1 }
 0x319   :  { %1008 = vsyncpa [#allocation7 + $0x1], 1 }
 0x31a   :  { %1009 = vsyncpa [#allocation5], 1 }
 0x31b   :  { %1011 = vsyncpa [#allocation5 + $0x1], 1 }

</bundles_post_ra>
